<compile_context>
chip_gen: v6e
topology: v6e:2x2x1
jax: 0.10.0
libtpu: 0.0.40
codegen_flags: <defaults>
</compile_context>

<pallas_src>
import functools

import jax
import jax.numpy as jnp
from jax.experimental import pallas as pl
from jax.experimental.pallas import tpu as pltpu


def _round_up(v, m):
    return ((v + m - 1) // m) * m


# --------------------------------------------------------------------------
# Pallas kernel: one grid step == TB batch samples, fully fused forward pass
# --------------------------------------------------------------------------
def _resblock_kernel(x_ref, *rest, K, P, L1e_p, L2p, pool_k, n_pool,
                     is_short_cut, has_mask):
    """Channels-last layout (channels on lanes, length on sublanes).

    x_ref    : (TB, Lp, Cin)       zero-padded input          (compute dtype)
    mask_ref : (1, L1e_p, 1)       0/1 valid-row mask          (f32, optional)
    w1_ref   : (K, Cin, Co)        conv1 weights, BN1 folded   (compute dtype)
    b1_ref   : (1, Co)             conv1 bias, BN1 folded      (f32)
    w2_ref   : (K*Co[+Cin], Co)    conv2 (+shortcut) weights   (compute dtype)
    b2_ref   : (1, Co)             conv2 (+shortcut) bias      (f32)
    o_ref    : (TB, n_pool, Co)    pooled output               (f32)
    """
    if has_mask:
        mask_ref, w1_ref, b1_ref, w2_ref, b2_ref, o_ref = rest
    else:
        w1_ref, b1_ref, w2_ref, b2_ref, o_ref = rest

    TB = o_ref.shape[0]
    Co = o_ref.shape[-1]
    Cin = x_ref.shape[-1]
    cdt = x_ref.dtype

    xf = x_ref[...]                                      # (TB, Lp, Cin)

    # ---- conv1 (+ folded BN1): K accumulated per-tap matmuls, f32 acc ------
    h1 = None
    for k in range(K):                                   # static, K is small
        tap = xf[:, k:k + L1e_p, :].reshape(TB * L1e_p, Cin)
        d = jnp.dot(tap, w1_ref[k], preferred_element_type=jnp.float32)
        h1 = d if h1 is None else h1 + d
    h1 = jnp.maximum(h1 + b1_ref[...], 0.0)              # (TB*L1e_p, Co) f32
    h1 = h1.reshape(TB, L1e_p, Co)

    # ---- conv2 "same" padding rows -> 0: single broadcast multiply ---------
    if has_mask:
        h1 = h1 * mask_ref[...]
    h1 = h1.astype(cdt)

    # ---- conv2 (+ folded BN2) [+ fused 1x1 shortcut]: one im2col matmul ----
    pieces = [h1[:, k:k + L2p, :] for k in range(K)]     # lane-aligned concat
    if is_short_cut:
        pieces.append(xf[:, 2 * P:2 * P + L2p, :])       # shortcut input slab
    h2in = jnp.concatenate(pieces, axis=-1)
    h2in = h2in.reshape(TB * L2p, h2in.shape[-1])
    out = jnp.dot(h2in, w2_ref[...], preferred_element_type=jnp.float32)
    out = jnp.maximum(out + b2_ref[...], 0.0)            # (TB*L2p, Co) f32
    out = out.reshape(TB, L2p, Co)

    # ---- MaxPool1d(kernel = stride = pool_k) -------------------------------
    if n_pool == 1:
        o_ref[...] = jnp.max(out[:, :pool_k, :], axis=1, keepdims=True)
    else:
        for q in range(n_pool):
            o_ref[:, q:q + 1, :] = jnp.max(
                out[:, q * pool_k:(q + 1) * pool_k, :], axis=1, keepdims=True)


# --------------------------------------------------------------------------
# Plain-JAX glue: BN folding, layout / padding, pallas_call setup
# --------------------------------------------------------------------------
def resblock_pallas(x, p, *, kernelsize, padding, is_short_cut, seq_length,
                    compute_dtype=jnp.bfloat16, batch_block=None):
    """x: (N, Cin, L) as PyTorch NCL.  Returns (N, Cout, n_pool), float32."""
    N, Cin, L = x.shape
    assert L == seq_length
    K, P = kernelsize, padding
    Cout = p["w1"].shape[0]

    L1 = L + 2 * P - K + 1                     # conv1 output length
    L2 = L1 + 2 * P - K + 1                    # conv2 output length
    L1e = L1 + 2 * P                           # conv1 output + conv2 pad rows
    pool_k = seq_length if is_short_cut else seq_length - 2 * kernelsize + 2
    n_pool = (L2 - pool_k) // pool_k + 1
    if is_short_cut:
        assert L2 == L, "shortcut add requires 'same'-style conv padding"

    Co = _round_up(Cout, 128)                  # lane-dense output channels
    # sublane-aligned lengths so the in-kernel (TB,L,C)<->(TB*L,C) reshapes are free
    L2p = _round_up(L2, 8)
    L1e_p = _round_up(max(L1e, L2p + K - 1), 8)
    Lp = _round_up(max(L1e_p + K - 1, 2 * P + L2p), 8)

    eps = 1e-5

    def fold(w, b, bn):
        # fold eval-mode BatchNorm into the preceding conv
        s = bn["gamma"] / jnp.sqrt(bn["var"] + eps)
        return w * s[:, None, None], (b - bn["mean"]) * s + bn["beta"]

    def pad_to(a, axis, size):
        pads = [(0, 0)] * a.ndim
        pads[axis] = (0, size - a.shape[axis])
        return jnp.pad(a, pads)

    w1f, b1f = fold(p["w1"], p["b1"], p["bn1"])
    w2f, b2f = fold(p["w2"], p["b2"], p["bn2"])

    # conv1 weights: (Cout, Cin, K) -> (K, Cin, Co)
    w1k = pad_to(jnp.transpose(w1f, (2, 1, 0)), 2, Co)
    # conv2 weights: (Cout, Cout, K) -> (K*Co, Co); shortcut rows appended below
    w2k = pad_to(pad_to(jnp.transpose(w2f, (2, 1, 0)), 1, Co), 2, Co)
    w2k = w2k.reshape(K * Co, Co)
    b1k = pad_to(b1f.reshape(1, Cout), 1, Co)
    b2tot = b2f
    if is_short_cut:
        wsf, bsf = fold(p["ws"], p["bs"], p["bns"])
        wsk = pad_to(jnp.transpose(wsf[:, :, 0], (1, 0)), 1, Co)   # (Cin, Co)
        w2k = jnp.concatenate([w2k, wsk], axis=0)                  # fuse shortcut
        b2tot = b2tot + bsf                                        # merge biases
    b2k = pad_to(b2tot.reshape(1, Cout), 1, Co)

    w1k = w1k.astype(compute_dtype)
    w2k = w2k.astype(compute_dtype)
    Kc = w2k.shape[0]

    # conv2 "same"-padding row mask (precomputed, one in-kernel multiply)
    has_mask = P > 0
    if has_mask:
        rows = jnp.arange(L1e_p)
        mask = ((rows >= P) & (rows < P + L1)).astype(jnp.float32)
        mask = mask.reshape(1, L1e_p, 1)

    # input: channels-last, cast to compute dtype BEFORE padding
    x_nlc = jnp.transpose(x, (0, 2, 1)).astype(compute_dtype)      # (N, L, Cin)
    x_pad = jnp.pad(x_nlc, ((0, 0), (2 * P, Lp - L - 2 * P), (0, 0)))

    # ---- generation-aware VMEM budget & batch blocking ----------------------
    try:
        vmem_cap = int(pltpu.get_tpu_info().vmem_capacity_bytes)
    except Exception:
        vmem_cap = 64 * 1024 * 1024            # conservative (v7x-sized) default
    vmem_limit = max(32 * 1024 * 1024,
                     min(96 * 1024 * 1024, (vmem_cap * 3) // 4))

    if batch_block is None:
        cb = jnp.dtype(compute_dtype).itemsize
        lane = 128
        per_sample = (2 * Lp * lane * cb               # 2x-buffered input block
                      + 2 * L1e_p * lane * cb          # live conv1 tap slices
                      + L1e_p * Co * (4 + cb)          # h1 f32 + compute-dtype copy
                      + L2p * (K * Co + lane) * cb     # conv2 im2col slab
                      + L2p * Co * 4                   # conv2 f32 output
                      + 2 * n_pool * Co * 4)           # 2x-buffered output block
        weight_bytes = 2 * (K * lane + Kc) * Co * cb + 4 * Co * 4
        budget = vmem_limit // 2 - weight_bytes
        tb_cap = max(1, budget // max(per_sample, 1))
        # >= 4 grid steps (>= 2 per TensorCore on 2-TC chips) when batch allows
        batch_block = int(max(1, min(tb_cap, 32, -(-N // 4))))
    TB = int(max(1, min(batch_block, N)))
    Np = _round_up(N, TB)
    if Np > N:
        x_pad = jnp.pad(x_pad, ((0, Np - N), (0, 0), (0, 0)))

    inputs = [x_pad]
    in_specs = [pl.BlockSpec((TB, Lp, Cin), lambda n: (n, 0, 0))]
    if has_mask:
        inputs.append(mask)
        in_specs.append(pl.BlockSpec((1, L1e_p, 1), lambda n: (0, 0, 0)))
    inputs += [w1k, b1k, w2k, b2k]
    in_specs += [
        pl.BlockSpec((K, Cin, Co), lambda n: (0, 0, 0)),
        pl.BlockSpec((1, Co), lambda n: (0, 0)),
        pl.BlockSpec((Kc, Co), lambda n: (0, 0)),
        pl.BlockSpec((1, Co), lambda n: (0, 0)),
    ]

    kernel = functools.partial(
        _resblock_kernel, K=K, P=P, L1e_p=L1e_p, L2p=L2p,
        pool_k=pool_k, n_pool=n_pool, is_short_cut=is_short_cut,
        has_mask=has_mask)

    out = pl.pallas_call(
        kernel,
        out_shape=jax.ShapeDtypeStruct((Np, n_pool, Co), jnp.float32),
        grid_spec=pltpu.PrefetchScalarGridSpec(
            num_scalar_prefetch=0,
            grid=(Np // TB,),
            in_specs=in_specs,
            out_specs=pl.BlockSpec((TB, n_pool, Co), lambda n: (n, 0, 0))),
        compiler_params=pltpu.CompilerParams(
            dimension_semantics=("parallel",),
            vmem_limit_bytes=int(vmem_limit)),
    )(*inputs)

    # drop batch / channel padding, back to PyTorch (N, Cout, n_pool)
    return jnp.transpose(out[:N, :, :Cout], (0, 2, 1))


# --------------------------------------------------------------------------
# Pure-JAX reference (for correctness check only)
# --------------------------------------------------------------------------
def _conv1d_nch(x, w, b, padding):
    y = jax.lax.conv_general_dilated(
        x, w, window_strides=(1,), padding=[(padding, padding)],
        dimension_numbers=("NCH", "OIH", "NCH"),
        precision=jax.lax.Precision.HIGHEST)
    return y + b[None, :, None]


def _bn_eval(x, bn, eps=1e-5):
    g, be, m, v = bn["gamma"], bn["beta"], bn["mean"], bn["var"]
    return ((x - m[None, :, None]) / jnp.sqrt(v[None, :, None] + eps)
            * g[None, :, None] + be[None, :, None])


def resblock_reference(x, p, *, kernelsize, padding, is_short_cut, seq_length):
    out = _conv1d_nch(x, p["w1"], p["b1"], padding)
    out = jax.nn.relu(_bn_eval(out, p["bn1"]))
    out = _conv1d_nch(out, p["w2"], p["b2"], padding)
    out = _bn_eval(out, p["bn2"])
    if is_short_cut:
        out = out + _bn_eval(_conv1d_nch(x, p["ws"], p["bs"], 0), p["bns"])
    out = jax.nn.relu(out)
    pool_k = seq_length if is_short_cut else seq_length - 2 * kernelsize + 2
    N, C, L2 = out.shape
    n_pool = (L2 - pool_k) // pool_k + 1
    out = out[:, :, :n_pool * pool_k].reshape(N, C, n_pool, pool_k)
    return out.max(axis=-1)


# --------------------------------------------------------------------------
# Deterministic parameter construction
# --------------------------------------------------------------------------
def init_params(key, Cin, Cout, K, is_short_cut):
    ks = jax.random.split(key, 16)

    def nrm(k, shape, scale=0.1):
        return scale * jax.random.normal(k, shape, dtype=jnp.float32)

    def bn(kg, kb, km, kv):
        return dict(gamma=1.0 + nrm(kg, (Cout,)), beta=nrm(kb, (Cout,)),
                    mean=nrm(km, (Cout,)),
                    var=0.5 + jax.random.uniform(kv, (Cout,), dtype=jnp.float32))

    p = {
        "w1": nrm(ks[0], (Cout, Cin, K)), "b1": nrm(ks[1], (Cout,)),
        "bn1": bn(ks[2], ks[3], ks[4], ks[5]),
        "w2": nrm(ks[6], (Cout, Cout, K)), "b2": nrm(ks[7], (Cout,)),
        "bn2": bn(ks[8], ks[9], ks[10], ks[11]),
    }
    if is_short_cut:
        p["ws"] = nrm(ks[12], (Cout, Cin, 1))
        p["bs"] = nrm(ks[13], (Cout,))
        p["bns"] = bn(ks[14], ks[15], ks[12], ks[13])
    return p


if __name__ == "__main__":
    Cin, Cout, K = 4, 8, 3
    SEQ_LENGTH = 16  # module hardcodes 150; scaled down for the small test

    key = jax.random.PRNGKey(0)
    ok = True
    cases = [
        # (is_short_cut, padding, N, batch_block, compute_dtype, abs tol)
        (True, 1, 5, 2, jnp.float32, 1e-2),       # shortcut + batch-padding path
        (False, 0, 4, None, jnp.float32, 1e-2),   # canonical non-shortcut block
        (False, 4, 3, 2, jnp.float32, 1e-2),      # n_pool > 1 pooling path
        (True, 1, 2, None, jnp.bfloat16, 1.5e-1), # bf16 (default dtype) smoke test
    ]
    for is_short_cut, padding, N, bb, cdt, tol in cases:
        key, pkey, xkey = jax.random.split(key, 3)
        params = init_params(pkey, Cin, Cout, K, is_short_cut)
        x = jax.random.normal(xkey, (N, Cin, SEQ_LENGTH), dtype=jnp.float32)

        y = resblock_pallas(x, params, kernelsize=K, padding=padding,
                            is_short_cut=is_short_cut, seq_length=SEQ_LENGTH,
                            compute_dtype=cdt, batch_block=bb)
        y = jax.block_until_ready(y)

        y_ref = resblock_reference(x, params, kernelsize=K, padding=padding,
                                   is_short_cut=is_short_cut,
                                   seq_length=SEQ_LENGTH)
        err = float(jnp.max(jnp.abs(y.astype(jnp.float32) - y_ref)))
        if err > tol:
            ok = False
            print(f"mismatch (short_cut={is_short_cut}, pad={padding}, "
                  f"dtype={jnp.dtype(cdt).name}): max abs err = {err}")

    if ok:
        print("KERNEL_OK")
</pallas_src>

<mosaic_0001>
module attributes {stable_mosaic.version = 11 : i64} {
  func.func @_resblock_kernel(%arg0: i32, %arg1: memref<2x32x4xf32, #tpu.memory_space<vmem>>, %arg2: memref<1x24x1xf32, #tpu.memory_space<vmem>>, %arg3: memref<3x4x128xf32, #tpu.memory_space<vmem>>, %arg4: memref<1x128xf32, #tpu.memory_space<vmem>>, %arg5: memref<388x128xf32, #tpu.memory_space<vmem>>, %arg6: memref<1x128xf32, #tpu.memory_space<vmem>>, %arg7: memref<2x1x128xf32, #tpu.memory_space<vmem>>) attributes {dimension_semantics = [#tpu.dimension_semantics<parallel>], iteration_bounds = array<i64: 3>, scalar_prefetch = 0 : i64, scratch_operands = 0 : i64, tpu.core_type = #tpu.core_type<tc>, window_params = [{transform_indices = @transform_0, window_bounds = array<i64: 2, 32, 4>}, {pipeline_mode = #tpu.pipeline_mode<synchronous>, transform_indices = @transform_1, window_bounds = array<i64: 1, 24, 1>}, {pipeline_mode = #tpu.pipeline_mode<synchronous>, transform_indices = @transform_2, window_bounds = array<i64: 3, 4, 128>}, {pipeline_mode = #tpu.pipeline_mode<synchronous>, transform_indices = @transform_3, window_bounds = array<i64: 1, 128>}, {pipeline_mode = #tpu.pipeline_mode<synchronous>, transform_indices = @transform_4, window_bounds = array<i64: 388, 128>}, {pipeline_mode = #tpu.pipeline_mode<synchronous>, transform_indices = @transform_5, window_bounds = array<i64: 1, 128>}, {transform_indices = @transform_6, window_bounds = array<i64: 2, 1, 128>}]} {
    %c0 = arith.constant 0 : index
    %c0_0 = arith.constant 0 : index
    %c0_1 = arith.constant 0 : index
    %0 = vector.load %arg1[%c0, %c0_0, %c0_1] : memref<2x32x4xf32, #tpu.memory_space<vmem>>, vector<2x32x4xf32>
    %1 = vector.extract_strided_slice %0 {offsets = [0, 0, 0], sizes = [2, 24, 4], strides = [1, 1, 1]} : vector<2x32x4xf32> to vector<2x24x4xf32>
    %2 = vector.shape_cast %1 : vector<2x24x4xf32> to vector<48x4xf32>
    %c0_2 = arith.constant 0 : index
    %c0_3 = arith.constant 0 : index
    %c0_4 = arith.constant 0 : index
    %3 = vector.load %arg3[%c0_2, %c0_3, %c0_4] : memref<3x4x128xf32, #tpu.memory_space<vmem>>, vector<1x4x128xf32>
    %4 = vector.shape_cast %3 : vector<1x4x128xf32> to vector<4x128xf32>
    %cst = arith.constant dense<0.000000e+00> : vector<48x128xf32>
    %5 = tpu.matmul %2, %4, %cst {dimension_numbers = #tpu.dot_dimension_numbers<[1], [0], [0], [1], [0, 0, 1, 1], [], []>} : vector<48x4xf32>, vector<4x128xf32>, vector<48x128xf32> -> vector<48x128xf32>
    %6 = vector.extract_strided_slice %0 {offsets = [0, 1, 0], sizes = [2, 24, 4], strides = [1, 1, 1]} : vector<2x32x4xf32> to vector<2x24x4xf32>
    %7 = vector.shape_cast %6 : vector<2x24x4xf32> to vector<48x4xf32>
    %c1 = arith.constant 1 : index
    %c0_5 = arith.constant 0 : index
    %c0_6 = arith.constant 0 : index
    %8 = vector.load %arg3[%c1, %c0_5, %c0_6] : memref<3x4x128xf32, #tpu.memory_space<vmem>>, vector<1x4x128xf32>
    %9 = vector.shape_cast %8 : vector<1x4x128xf32> to vector<4x128xf32>
    %cst_7 = arith.constant dense<0.000000e+00> : vector<48x128xf32>
    %10 = tpu.matmul %7, %9, %cst_7 {dimension_numbers = #tpu.dot_dimension_numbers<[1], [0], [0], [1], [0, 0, 1, 1], [], []>} : vector<48x4xf32>, vector<4x128xf32>, vector<48x128xf32> -> vector<48x128xf32>
    %11 = arith.addf %5, %10 : vector<48x128xf32>
    %12 = vector.extract_strided_slice %0 {offsets = [0, 2, 0], sizes = [2, 24, 4], strides = [1, 1, 1]} : vector<2x32x4xf32> to vector<2x24x4xf32>
    %13 = vector.shape_cast %12 : vector<2x24x4xf32> to vector<48x4xf32>
    %c2 = arith.constant 2 : index
    %c0_8 = arith.constant 0 : index
    %c0_9 = arith.constant 0 : index
    %14 = vector.load %arg3[%c2, %c0_8, %c0_9] : memref<3x4x128xf32, #tpu.memory_space<vmem>>, vector<1x4x128xf32>
    %15 = vector.shape_cast %14 : vector<1x4x128xf32> to vector<4x128xf32>
    %cst_10 = arith.constant dense<0.000000e+00> : vector<48x128xf32>
    %16 = tpu.matmul %13, %15, %cst_10 {dimension_numbers = #tpu.dot_dimension_numbers<[1], [0], [0], [1], [0, 0, 1, 1], [], []>} : vector<48x4xf32>, vector<4x128xf32>, vector<48x128xf32> -> vector<48x128xf32>
    %17 = arith.addf %11, %16 : vector<48x128xf32>
    %c0_11 = arith.constant 0 : index
    %c0_12 = arith.constant 0 : index
    %18 = vector.load %arg4[%c0_11, %c0_12] : memref<1x128xf32, #tpu.memory_space<vmem>>, vector<1x128xf32>
    %19 = vector.broadcast %18 : vector<1x128xf32> to vector<48x128xf32>
    %20 = arith.addf %17, %19 : vector<48x128xf32>
    %cst_13 = arith.constant 0.000000e+00 : f32
    %21 = vector.broadcast %cst_13 : f32 to vector<48x128xf32>
    %22 = arith.maximumf %20, %21 : vector<48x128xf32>
    %23 = vector.shape_cast %22 : vector<48x128xf32> to vector<2x24x128xf32>
    %c0_14 = arith.constant 0 : index
    %c0_15 = arith.constant 0 : index
    %c0_16 = arith.constant 0 : index
    %24 = vector.load %arg2[%c0_14, %c0_15, %c0_16] : memref<1x24x1xf32, #tpu.memory_space<vmem>>, vector<1x24x1xf32>
    %25 = vector.broadcast %24 : vector<1x24x1xf32> to vector<2x24x128xf32>
    %26 = arith.mulf %23, %25 : vector<2x24x128xf32>
    %27 = vector.extract_strided_slice %26 {offsets = [0, 0, 0], sizes = [2, 16, 128], strides = [1, 1, 1]} : vector<2x24x128xf32> to vector<2x16x128xf32>
    %28 = vector.extract_strided_slice %26 {offsets = [0, 1, 0], sizes = [2, 16, 128], strides = [1, 1, 1]} : vector<2x24x128xf32> to vector<2x16x128xf32>
    %29 = vector.extract_strided_slice %26 {offsets = [0, 2, 0], sizes = [2, 16, 128], strides = [1, 1, 1]} : vector<2x24x128xf32> to vector<2x16x128xf32>
    %30 = vector.extract_strided_slice %0 {offsets = [0, 2, 0], sizes = [2, 16, 4], strides = [1, 1, 1]} : vector<2x32x4xf32> to vector<2x16x4xf32>
    %31 = tpu.concatenate %27, %28, %29, %30 in 2 : vector<2x16x128xf32>, vector<2x16x128xf32>, vector<2x16x128xf32>, vector<2x16x4xf32> -> vector<2x16x388xf32>
    %32 = vector.shape_cast %31 : vector<2x16x388xf32> to vector<32x388xf32>
    %c0_17 = arith.constant 0 : index
    %c0_18 = arith.constant 0 : index
    %33 = vector.load %arg5[%c0_17, %c0_18] : memref<388x128xf32, #tpu.memory_space<vmem>>, vector<388x128xf32>
    %cst_19 = arith.constant dense<0.000000e+00> : vector<32x128xf32>
    %34 = tpu.matmul %32, %33, %cst_19 {dimension_numbers = #tpu.dot_dimension_numbers<[1], [0], [0], [1], [0, 0, 1, 1], [], []>} : vector<32x388xf32>, vector<388x128xf32>, vector<32x128xf32> -> vector<32x128xf32>
    %c0_20 = arith.constant 0 : index
    %c0_21 = arith.constant 0 : index
    %35 = vector.load %arg6[%c0_20, %c0_21] : memref<1x128xf32, #tpu.memory_space<vmem>>, vector<1x128xf32>
    %36 = vector.broadcast %35 : vector<1x128xf32> to vector<32x128xf32>
    %37 = arith.addf %34, %36 : vector<32x128xf32>
    %cst_22 = arith.constant 0.000000e+00 : f32
    %38 = vector.broadcast %cst_22 : f32 to vector<32x128xf32>
    %39 = arith.maximumf %37, %38 : vector<32x128xf32>
    %40 = vector.shape_cast %39 : vector<32x128xf32> to vector<2x16x128xf32>
    %cst_23 = arith.constant dense<0xFF800000> : vector<2x128xf32>
    %41 = vector.multi_reduction <maximumf>, %40, %cst_23 [1] : vector<2x16x128xf32> to vector<2x128xf32>
    %42 = vector.shape_cast %41 : vector<2x128xf32> to vector<2x1x128xf32>
    %c0_24 = arith.constant 0 : index
    %c0_25 = arith.constant 0 : index
    %c0_26 = arith.constant 0 : index
    %43 = vector.load %arg7[%c0_24, %c0_25, %c0_26] : memref<2x1x128xf32, #tpu.memory_space<vmem>>, vector<2x1x128xf32>
    tpu.vector_store %arg7[%c0_24, %c0_25, %c0_26], %42 {strides = array<i32>} : memref<2x1x128xf32, #tpu.memory_space<vmem>>, vector<2x1x128xf32>,
    return
  }
  func.func @transform_0(%arg0: i32) -> (i32, i32, i32) {
    %c0_i32 = arith.constant 0 : i32
    %c0_i32_0 = arith.constant 0 : i32
    %c0_i32_1 = arith.constant 0 : i32
    return %arg0, %c0_i32, %c0_i32_0 : i32, i32, i32
  }
  func.func @transform_1(%arg0: i32) -> (i32, i32, i32) {
    %c0_i32 = arith.constant 0 : i32
    %c0_i32_0 = arith.constant 0 : i32
    %c0_i32_1 = arith.constant 0 : i32
    %c0_i32_2 = arith.constant 0 : i32
    return %c0_i32, %c0_i32_0, %c0_i32_1 : i32, i32, i32
  }
  func.func @transform_2(%arg0: i32) -> (i32, i32, i32) {
    %c0_i32 = arith.constant 0 : i32
    %c0_i32_0 = arith.constant 0 : i32
    %c0_i32_1 = arith.constant 0 : i32
    %c0_i32_2 = arith.constant 0 : i32
    return %c0_i32, %c0_i32_0, %c0_i32_1 : i32, i32, i32
  }
  func.func @transform_3(%arg0: i32) -> (i32, i32) {
    %c0_i32 = arith.constant 0 : i32
    %c0_i32_0 = arith.constant 0 : i32
    %c0_i32_1 = arith.constant 0 : i32
    return %c0_i32, %c0_i32_0 : i32, i32
  }
  func.func @transform_4(%arg0: i32) -> (i32, i32) {
    %c0_i32 = arith.constant 0 : i32
    %c0_i32_0 = arith.constant 0 : i32
    %c0_i32_1 = arith.constant 0 : i32
    return %c0_i32, %c0_i32_0 : i32, i32
  }
  func.func @transform_5(%arg0: i32) -> (i32, i32) {
    %c0_i32 = arith.constant 0 : i32
    %c0_i32_0 = arith.constant 0 : i32
    %c0_i32_1 = arith.constant 0 : i32
    return %c0_i32, %c0_i32_0 : i32, i32
  }
  func.func @transform_6(%arg0: i32) -> (i32, i32, i32) {
    %c0_i32 = arith.constant 0 : i32
    %c0_i32_0 = arith.constant 0 : i32
    %c0_i32_1 = arith.constant 0 : i32
    return %arg0, %c0_i32, %c0_i32_0 : i32, i32, i32
  }
}

</mosaic_0001>

<bundles_post_ra>
// kernel: tpu_custom_call.1
= control target key start
LH: loop header
LB: loop body
LE: loop exit
PB: predicated region body
PF: predicated region fallthrough
CT: control target
= control target key end

     0   :  { %11 = vsyncpa [#allocation3], 0  ;;  %s1661_s0 = inlined_call_operand.vmem [shape: f32[6,32,4], index: 0, kind: input, shape index: {}]   ;;  %s1662_s1 = inlined_call_operand.vmem [shape: f32[1,24,1], index: 1, kind: input, shape index: {}]   ;;  %s1663_s2 = inlined_call_operand.vmem [shape: f32[3,4,128], index: 2, kind: input, shape index: {}]   ;;  %s1664_s3 = inlined_call_operand.vmem [shape: f32[1,128], index: 3, kind: input, shape index: {}]   ;;  %s1665_s4 = inlined_call_operand.hbm [shape: f32[388,128], index: 4, kind: input, shape index: {}]   ;;  %s1666_s5 = inlined_call_operand.vmem [shape: f32[1,128], index: 5, kind: input, shape index: {}]   ;;  %s1667_s6 = inlined_call_operand.hbm [shape: f32[6,1,128], index: 6, kind: output, shape index: {}]  }
   0x1   :  { %12 = vsyncpa [#allocation4], 0 }
   0x2   :  { %14 = vsyncpa [#allocation4 + $0x1], 0  ;;  %s1414_s21 = smov 0   ;;  %s1416_s22 = smov 0  }
   0x3   :  { %s1418_s23 = smov 0   ;;  %s1420_s24 = smov 0  }
   0x4 LB: > { %s1435_s25 = sadd.s32 4294967295, %s1369_s24   ;;  %s1074_s26 = sadd.s32 4294967294, %s1369_s24   ;;  %s1369_s24 = sphi %s1420_s24, %s1675_s24   ;;  %s1365_s23 = sphi %s1418_s23, %s1674_s23   ;;  %s1361_s22 = sphi %s1416_s22, %s1673_s22   ;;  %s1357_s21 = sphi %s1414_s21, %s1672_s21  }
   0x5   : > { %s1439_s27 = sadd.s32 1, %s1369_s24   ;;  %s158_s28 = sadd.s32 1, %s1365_s23 }
   0x6   : > { %s155_s29 = ssub.s32 %s1369_s24, %s1439_s27  ;;  %p168_p0 = scmp.ne.s32.totalorder %s1365_s23, %s1361_s22 }
   0x7   : > { %p156_p1 = scmp.eq.s32.totalorder %s155_s29, 0  ;;  %p169_p2 = scmp.eq.s32.totalorder %s1435_s25, 2 }
   0x8   : > { %p174_p3 = scmp.ne.s32.totalorder %s1361_s22, %s1357_s21  ;;  %p175_p4 = scmp.eq.s32.totalorder %s1074_s26, 2 }
   0x9   : > { %s1450_s30 = scalar_select %p156_p1, %s1365_s23, %s158_s28  }
   0xa   : > { %p1452_p5 = por %p169_p2, %p168_p0  ;;  %p1456_p6 = por %p175_p4, %p174_p3 }
   0xb   : > { %p1075_p7 = scmp.ge.s32.totalorder %s1369_s24, 1  ;;  %p182_p8 = scmp.lt.s32.totalorder %s1369_s24, 4 }
   0xc   : > { %s1669_s8 = scalar_select %p1456_p6, 1, 0 }
   0xd   : > { %p1235_p9 = scmp.eq.s32.totalorder %s1435_s25, 0  ;;  %p1463_p10 = pnand %p1075_p7, %p182_p8 }
   0xe   : > { %s1371_s10 = smov [#allocation2]  }
   0xf   : > { %s203_s11 = sshll.u32 %s1371_s10, 4  ;;  %p1227_p11 = pneg %p1463_p10  ;;  %s204_s11 = int_to_ptr.vmem [resolvable:$true] %s203_s11 }
  0x10   : > { %s1290_s12 = scalar_lea.vmem %s204_s11, 6272  ;;  %p1298_p3 = scmp.lt.s32.totalorder %s204_s11, %s204_s11 }
  0x11   : > { %p1228_p12 = pnand %p1235_p9, %p1227_p11  ;;  %p1291_p0 = scmp.ne.s32.totalorder %s204_s11, %s1290_s12 }
  0x12   : > { %p1299_p4 = scmp.lt.s32.totalorder %s1290_s12, %s1290_s12 }
  0x13   : > { %p1281_p13 = pneg %p1228_p12 }
  0x14   : > { %p1300_p6 = por %p1299_p4, %p1298_p3 }
  0x15   : > { %p1293_p1 = pnand %p1291_p0, %p1281_p13 }
  0x17   : > { %p1294_p2 = pneg %p1293_p1 }
  0x19   : > { %p1301_p7 = pnand %p1300_p6, %p1294_p2 }
  0x1b   : > { %1304 = shalt.err (!%p1301_p7)
}
  0x1c   : > { %s1372_s13 = smov 128   ;;  %s1373_s14 = smov 8  }
  0x1d   : > { %1230 = dma.hbm_to_vmem [thread:$0]  (!%p1228_p12), %s1665_s4, 6272, %s204_s11, [#allocation3], %s1372_s13, %s1372_s13, %s1373_s14  }
  0x1e   : > { %232 = sbr.rel (%p1463_p10) target bundleno = 507 (0x1fb), region = 44 }
  0x23   : > { %1348 = dma.done.wait (%p1235_p9), [#allocation3], 6272  }
  0x24   : > { %1350 = vsyncadd (%p1235_p9), [#allocation3], 4294961024  ;;  %s1081_s17 = sshll.u32 %s1435_s25, 1  ;;  %v1374_v0 = vmov 0   ;;  %vm318_vm0 = vcmask 1043456   ;;  %vm288_vm1 = vcmask 1046528  }
  0x25   : > { %p264_p8 = scmp.lt.s32.totalorder %s1081_s17, 5  ;;  %1277 = vset.pattern.permute.xlu0 %v1374_v0  ;;  %1278 = vset.pattern.permute.xlu1 %v1374_v0  ;;  %v1084_v1 = vld [vmem:[%s1663_s2 + $0x4] sm:$0xf]  ;;  %vm305_vm2 = vcmask 31744   ;;  %v279_v6 = vld [vmem:[%s1663_s2] sm:$0xf] }
  0x26   : > { %1219 = vmatprep.subr.msk.mxu1 %vm318_vm0, %v1084_v1  ;;  %1186 = vmatprep.subr.msk.mxu0 %vm318_vm0, %v1084_v1  ;;  %vm527_vm3 = vcmask 1045504   ;;  %v1099_v20 = vld [vmem:[%s1663_s2 + $0x8] sm:$0xf]  ;;  %v679_v31 = vld [vmem:[%s1662_s1] sm:$0xff]  ;;  %v681_v32 = vld [vmem:[%s1662_s1 + $0x10] sm:$0xff]  ;;  %v1375_v40 = vmov 0.0  }
  0x27   : > { %s1677_s17 = smov (!%p264_p8, %s1081_s17), 5  ;;  %1220 = vmatpush3.msk.msra.mxu1 %vm318_vm0, %v1084_v1  ;;  %1187 = vmatpush3.msk.msra.mxu0 %vm318_vm0, %v1084_v1  ;;  %v784_v38 = vld [vmem:[#allocation2 + $0x178] sm:$0xff]  ;;  %v680_v39 = vld [vmem:[%s1662_s1 + $0x8] sm:$0xff]  ;;  %v783_v45 = vld [vmem:[#allocation2 + $0x170] sm:$0xff]  ;;  %s260_s29 = sand.u32 1, %s1361_s22  }
  0x28   : > { %s1119_s18 = sshll.u32 %s1677_s17, 5  ;;  %1197 = vmatprep.subr.msk.mxu1 %vm318_vm0, %v279_v6  ;;  %1208 = vmatprep.subr.msk.mxu0 %vm318_vm0, %v1099_v20  ;;  %v768_v43 = vld [vmem:[#allocation2 + $0xf8] sm:$0xff]  ;;  %v767_v48 = vld [vmem:[#allocation2 + $0xf0] sm:$0xff]  ;;  %v782_v49 = vld [vmem:[#allocation2 + $0x168] sm:$0xff]  ;;  %s1080_s9 = sshll.u32 %s260_s29, 1 }
  0x29   : > { %s268_s26 = scalar_lea.vmem %s1661_s0, %s1119_s18  ;;  %684 = vperm.xlu0 %1277, %v679_v31   ;;  %694 = vperm.xlu1 %1278, %v681_v32   ;;  %v752_v46 = vld [vmem:[#allocation2 + $0x78] sm:$0xff]  ;;  %v751_v50 = vld [vmem:[#allocation2 + $0x70] sm:$0xff]  ;;  %v766_v51 = vld [vmem:[#allocation2 + $0xe8] sm:$0xff]  ;;  %s262_s10 = scalar_lea.vmem [#allocation5], %s1080_s9 }
  0x2a   : > { %v1487_v2 = vld [vmem:[%s268_s26 + $0x10] sm:$0xff]  ;;  %v274_v3 = vld [vmem:[%s268_s26 + $0x18] sm:$0xff]  ;;  %v1496_v7 = vld [vmem:[%s268_s26 + $0x20] sm:$0xff]  ;;  %s1120_s11 = sshll.u32 %s1435_s25, 5  ;;  %s1000_s12 = sshll.u32 %s262_s10, 4  ;;  %s1619_s12 = int_to_ptr.vmem [resolvable:$true] %s1000_s12 }
  0x2b   : > { %v292_v4 = vrot.slane %v1487_v2, 1  ;;  %v294_v5 = vrot.slane %v274_v3, 1  ;;  %v1498_v8 = vld [vmem:[%s268_s26 + $0x28] sm:$0xff]  ;;  %v271_v9 = vld [vmem:[%s268_s26] sm:$0xff]  ;;  %v296_v11 = vrot.slane %v1496_v7, 1  ;;  %v1505_v15 = vld [vmem:[%s268_s26 + $0x30] sm:$0xff]  ;;  %s1617_s15 = scalar_lea.hbm %s1667_s6, %s1120_s11 }
  0x2c   : > { %v297_v12 = vrot.slane %v1498_v8, 1  ;;  %v272_v13 = vld [vmem:[%s268_s26 + $0x8] sm:$0xff]  ;;  %v289_v14 = vrot.slane %v271_v9, 1  ;;  %v278_v16 = vld [vmem:[%s268_s26 + $0x38] sm:$0xff]  ;;  %v299_v18 = vrot.slane %v1505_v15, 1  ;;  %v528_v21 = vrot.slane %v271_v9, 2 }
  0x2d   : > { %v295_v10 = vsel %vm288_vm1, %v292_v4, %v294_v5  ;;  %v290_v17 = vrot.slane %v272_v13, 1  ;;  %v301_v19 = vrot.slane %v278_v16, 1  ;;  %v531_v22 = vrot.slane %v1487_v2, 2  ;;  %689 = vperm.xlu0 %1277, %v680_v39   ;;  %v781_v52 = vld [vmem:[#allocation2 + $0x160] sm:$0xff]  ;;  %v750_v53 = vld [vmem:[#allocation2 + $0x68] sm:$0xff]  ;;  %v780_v55 = vld [vmem:[#allocation2 + $0x158] sm:$0xff] }
  0x2e   : > { %1191 = vmatprep.mubr.msk.f32.mxu1 %vm305_vm2, %v295_v10  ;;  %v298_v23 = vsel %vm288_vm1, %v296_v11, %v297_v12  ;;  %v529_v24 = vrot.slane %v272_v13, 2  ;;  %v533_v25 = vrot.slane %v274_v3, 2  ;;  %v300_v27 = vsel %vm288_vm1, %v297_v12, %v299_v18  ;;  %v765_v54 = vld [vmem:[#allocation2 + $0xe0] sm:$0xff]  ;;  %v764_v57 = vld [vmem:[#allocation2 + $0xd8] sm:$0xff]  ;;  %v779_v58 = vld [vmem:[#allocation2 + $0x150] sm:$0xff]  ;;  %s1621_s16 = scalar_lea.sflag [#allocation4], %s260_s29 }
  0x2f   : > { %1192 = vmatmul.mubr.msk.f32.vlgmr.msra.gmra.mxu1 %vm305_vm2, %v298_v23  ;;  %v291_v26 = vsel %vm288_vm1, %v289_v14, %v290_v17  ;;  %v293_v28 = vsel %vm288_vm1, %v290_v17, %v292_v4  ;;  %v302_v29 = vsel %vm288_vm1, %v299_v18, %v301_v19  ;;  %v535_v34 = vrot.slane %v1496_v7, 2  ;;  %v749_v56 = vld [vmem:[#allocation2 + $0x60] sm:$0xff]  ;;  %v748_v59 = vld [vmem:[#allocation2 + $0x58] sm:$0xff]  ;;  %v763_v60 = vld [vmem:[#allocation2 + $0xd0] sm:$0xff]  ;;  %s1305_s17 = scalar_lea.vmem %s1619_s12, 32  ;;  %s1376_s25 = smov [#allocation5]  }
  0x30   : > { %1198 = vmatpush3.msk.msra.mxu1 %vm318_vm0, %v279_v6  ;;  %1188 = vmatprep.mubr.msk.f32.mxu0 %vm305_vm2, %v291_v26  ;;  %v1523_v30 = vsel %vm527_vm3, %v528_v21, %v529_v24  ;;  %v1537_v33 = vsel %vm527_vm3, %v529_v24, %v531_v22  ;;  %v536_v35 = vrot.slane %v1498_v8, 2  ;;  %v534_v36 = vsel %vm527_vm3, %v531_v22, %v533_v25  ;;  %v778_v61 = vld [vmem:[#allocation2 + $0x148] sm:$0xff]  ;;  %v747_v62 = vld [vmem:[#allocation2 + $0x50] sm:$0xff]  ;;  %v777_v0 = vld [vmem:[#allocation2 + $0x140] sm:$0xff]  ;;  %p1306_p6 = scmp.ne.s32.totalorder %s1619_s12, %s1305_s17  ;;  %s1309_s18 = sshll.u32 %s1376_s25, 4  ;;  %s1310_s18 = int_to_ptr.vmem [resolvable:$false] %s1309_s18 }
  0x31   : > { %1194 = vmatprep.mubr.msk.f32.mxu1 %vm305_vm2, %v300_v27  ;;  %1189 = vmatmul.mubr.msk.f32.vlgmr.msra.gmra.mxu0 %vm305_vm2, %v293_v28  ;;  %v538_v37 = vrot.slane %v1505_v15, 2  ;;  %v540_v42 = vrot.slane %v278_v16, 2  ;;  %v762_v63 = vld [vmem:[#allocation2 + $0xc8] sm:$0xff]  ;;  %v776_v3 = vld [vmem:[#allocation2 + $0x138] sm:$0xff]  ;;  %v745_v4 = vld [vmem:[#allocation2 + $0x40] sm:$0xff]  ;;  %s1311_s19 = scalar_lea.vmem %s1310_s18, 64  ;;  %p1312_p11 = scmp.lt.s32.totalorder %s1619_s12, %s1310_s18 }
  0x32   : > { %1209 = vmatpush3.msk.msra.mxu0 %vm318_vm0, %v1099_v20  ;;  %1210 = vmatprep.mubr.msk.f32.mxu0 %vm305_vm2, %v1523_v30  ;;  %v1553_v41 = vsel %vm527_vm3, %v535_v34, %v536_v35  ;;  %v746_v1 = vld [vmem:[#allocation2 + $0x48] sm:$0xff]  ;;  %v760_v5 = vld [vmem:[#allocation2 + $0xb8] sm:$0xff]  ;;  %v775_v6 = vld [vmem:[#allocation2 + $0x130] sm:$0xff]  ;;  %p1307_p9 = pnand %p1306_p6, %p1452_p5  ;;  %p1313_p12 = scmp.lt.s32.totalorder %s1311_s19, %s1305_s17 }
  0x33   : > { %1195 = vmatmul.mubr.msk.f32.gmra.mxu1 %vm305_vm2, %v302_v29  ;;  %881 = vmatprep.subr.mxu0 %v1375_v40  ;;  %v1557_v44 = vsel %vm527_vm3, %v536_v35, %v538_v37  ;;  %v541_v47 = vsel %vm527_vm3, %v538_v37, %v540_v42  ;;  %v743_v10 = vld [vmem:[#allocation2 + $0x30] sm:$0xff]  ;;  %v758_v11 = vld [vmem:[#allocation2 + $0xa8] sm:$0xff]  ;;  %v773_v12 = vld [vmem:[#allocation2 + $0x120] sm:$0xff] }
  0x34   : > { %1199 = vmatprep.mubr.msk.f32.mxu1 %vm305_vm2, %v271_v9  ;;  %1142 = vmatprep.subr.mxu1 %v768_v43  ;;  %v774_v9 = vld [vmem:[#allocation2 + $0x128] sm:$0xff]  ;;  %v757_v14 = vld [vmem:[#allocation2 + $0xa0] sm:$0xff]  ;;  %v756_v17 = vld [vmem:[#allocation2 + $0x98] sm:$0xff]  ;;  %p1308_p10 = pneg %p1307_p9  ;;  %p1314_p13 = por %p1313_p12, %p1312_p11 }
  0x35   : > { %1211 = vmatmul.mubr.msk.f32.vlgmr.msra.gmra.mxu0 %vm305_vm2, %v1537_v33  ;;  %v741_v16 = vld [vmem:[#allocation2 + $0x20] sm:$0xff]  ;;  %v771_v18 = vld [vmem:[#allocation2 + $0x110] sm:$0xff]  ;;  %v740_v19 = vld [vmem:[#allocation2 + $0x18] sm:$0xff] }
  0x36   : > { %1213 = vmatprep.mubr.msk.f32.mxu0 %vm305_vm2, %v534_v36  ;;  %882 = vmatpush1.msra.mxu0 %v784_v38  ;;  %v755_v20 = vld [vmem:[#allocation2 + $0x90] sm:$0xff]  ;;  %v770_v21 = vld [vmem:[#allocation2 + $0x108] sm:$0xff]  ;;  %v769_v24 = vld [vmem:[#allocation2 + $0x100] sm:$0xff]  ;;  %p1315_p0 = pnand %p1314_p13, %p1308_p10 }
  0x37   : > { %1200 = vmatmul.mubr.msk.f32.vlgmr.msra.gmra.mxu1 %vm305_vm2, %v272_v13  ;;  %883 = vmatprep.subr.mxu0 %v1375_v40  ;;  %v742_v13 = vld [vmem:[#allocation2 + $0x28] sm:$0xff]  ;;  %v739_v22 = vld [vmem:[#allocation2 + $0x10] sm:$0xff]  ;;  %v753_v26 = vld [vmem:[#allocation2 + $0x80] sm:$0xff] }
  0x38   : > { %1202 = vmatprep.mubr.msk.f32.mxu1 %vm305_vm2, %v1487_v2  ;;  %884 = vmatpush1.msra.mxu0 %v783_v45  ;;  %v761_v2 = vld [vmem:[#allocation2 + $0xc0] sm:$0xff]  ;;  %v754_v23 = vld [vmem:[#allocation2 + $0x88] sm:$0xff] }
  0x39   : > { %1214 = vmatmul.mubr.msk.f32.gmra.mxu0 %vm305_vm2, %v1553_v41  ;;  %885 = vmatprep.subr.mxu0 %v1375_v40  ;;  %v738_v25 = vld [vmem:[#allocation2 + $0x8] sm:$0xff]  ;;  %v785_v27 = vld [vmem:[#allocation2 + $0x180] sm:$0xf] }
  0x3a   : > { %1216 = vmatprep.mubr.msk.f32.mxu0 %vm305_vm2, %v1557_v44  ;;  %1143 = vmatpush3.msra.mxu1 %v752_v46  ;;  %v737_v28 = vld [vmem:[#allocation2] sm:$0xff] }
  0x3b   : > { %1203 = vmatmul.mubr.msk.f32.gmra.mxu1 %vm305_vm2, %v1496_v7  ;;  %1144 = vmatprep.subr.mxu1 %v767_v48  ;;  %v744_v7 = vld [vmem:[#allocation2 + $0x38] sm:$0xff] }
  0x3c   : > { %1205 = vmatprep.mubr.msk.f32.mxu1 %vm305_vm2, %v1498_v8  ;;  %886 = vmatpush1.msra.mxu0 %v782_v49  ;;  %v759_v8 = vld [vmem:[#allocation2 + $0xb0] sm:$0xff] }
  0x3d   : > { %1217 = vmatmul.mubr.msk.f32.gmra.mxu0 %vm305_vm2, %v541_v47  ;;  %1145 = vmatpush3.msra.mxu1 %v751_v50 }
  0x3e   : > { %887 = vmatprep.subr.mxu0 %v1375_v40  ;;  %1146 = vmatprep.subr.mxu1 %v766_v51 }
  0x3f   : > { %1206 = vmatmul.mubr.msk.f32.gmra.mxu1 %vm305_vm2, %v1505_v15  ;;  %888 = vmatpush1.msra.mxu0 %v781_v52  ;;  %v772_v15 = vld [vmem:[#allocation2 + $0x118] sm:$0xff] }
  0x40   : > { %1147 = vmatpush3.msra.mxu1 %v750_v53  ;;  %889 = vmatprep.subr.mxu0 %v1375_v40 }
  0x41   : > { %1148 = vmatprep.subr.mxu1 %v765_v54  ;;  %890 = vmatpush1.msra.mxu0 %v780_v55 }
  0x42   : > { %891 = vmatprep.subr.mxu0 %v1375_v40  ;;  %1110 = vmatprep.mubr.msk.f32.mxu0 %vm305_vm2, %v1523_v30 }
  0x43   : > { %1149 = vmatpush3.msra.mxu1 %v749_v56  ;;  %892 = vmatpush1.msra.mxu0 %v779_v58 }
  0x44   : > { %1150 = vmatprep.subr.mxu1 %v764_v57  ;;  %893 = vmatprep.subr.mxu0 %v1375_v40 }
  0x45   : > { %1151 = vmatpush3.msra.mxu1 %v748_v59  ;;  %894 = vmatpush1.msra.mxu0 %v778_v61 }
  0x46   : > { %1152 = vmatprep.subr.mxu1 %v763_v60  ;;  %895 = vmatprep.subr.mxu0 %v1375_v40 }
  0x47   : > { %1153 = vmatpush3.msra.mxu1 %v747_v62  ;;  %896 = vmatpush1.msra.mxu0 %v777_v0 }
  0x48   : > { %1154 = vmatprep.subr.mxu1 %v762_v63  ;;  %897 = vmatprep.subr.mxu0 %v1375_v40 }
  0x49   : > { %1155 = vmatpush3.msra.mxu1 %v746_v1  ;;  %898 = vmatpush1.msra.mxu0 %v776_v3 }
  0x4a   : > { %1156 = vmatprep.subr.mxu1 %v761_v2  ;;  %899 = vmatprep.subr.mxu0 %v1375_v40 }
  0x4b   : > { %1157 = vmatpush3.msra.mxu1 %v745_v4  ;;  %900 = vmatpush1.msra.mxu0 %v775_v6 }
  0x4c   : > { %1158 = vmatprep.subr.mxu1 %v760_v5  ;;  %901 = vmatprep.subr.mxu0 %v1375_v40 }
  0x4d   : > { %1159 = vmatpush3.msra.mxu1 %v744_v7  ;;  %902 = vmatpush1.msra.mxu0 %v774_v9 }
  0x4e   : > { %1160 = vmatprep.subr.mxu1 %v759_v8  ;;  %903 = vmatprep.subr.mxu0 %v1375_v40 }
  0x4f   : > { %1161 = vmatpush3.msra.mxu1 %v743_v10  ;;  %904 = vmatpush1.msra.mxu0 %v773_v12 }
  0x50   : > { %1162 = vmatprep.subr.mxu1 %v758_v11  ;;  %905 = vmatprep.subr.mxu0 %v1375_v40 }
  0x51   : > { %1163 = vmatpush3.msra.mxu1 %v742_v13  ;;  %906 = vmatpush1.msra.mxu0 %v772_v15 }
  0x52   : > { %1164 = vmatprep.subr.mxu1 %v757_v14  ;;  %907 = vmatprep.subr.mxu0 %v1375_v40 }
  0x53   : > { %1165 = vmatpush3.msra.mxu1 %v741_v16  ;;  %908 = vmatpush1.msra.mxu0 %v771_v18 }
  0x54   : > { %1166 = vmatprep.subr.mxu1 %v756_v17  ;;  %909 = vmatprep.subr.mxu0 %v1375_v40 }
  0x55   : > { %1167 = vmatpush3.msra.mxu1 %v740_v19  ;;  %910 = vmatpush1.msra.mxu0 %v770_v21 }
  0x56   : > { %1168 = vmatprep.subr.mxu1 %v755_v20  ;;  %911 = vmatprep.subr.mxu0 %v1375_v40 }
  0x57   : > { %1169 = vmatpush3.msra.mxu1 %v739_v22  ;;  %912 = vmatpush1.msra.mxu0 %v769_v24 }
  0x58   : > { %1170 = vmatprep.subr.mxu1 %v754_v23  ;;  %943 = vmatprep.subr.mxu0 %v1375_v40  ;;  %v1107_v40 = vld [vmem:[%s1664_s3] ss:$0 sm:$0xff] }
  0x59   : > { %1171 = vmatpush3.msra.mxu1 %v738_v25  ;;  %1109 = vmatpush2.msk.msra.mxu0 %vm318_vm0, %v785_v27 }
  0x5a   : > { %1172 = vmatprep.subr.mxu1 %v753_v26 }
  0x5b   : > { %1173 = vmatpush3.msra.mxu1 %v737_v28 }
  0xa4   : > { %v685_v42 = vpop.permute.xlu0 %684  ;;  %v695_v11 = vpop.permute.xlu1 %694 }
  0xa8   : > { %v690_v58 = vpop.permute.xlu0 %689 }
  0xef   : > { %v1193_v29 = vpop.f32.mrf.mxu1 }
  0xf1   : > { %v398_v30 = vpop.f32.mrf.mxu1  ;;  %v1190_v31 = vpop.f32.mrf.mxu0 }
  0xf3   : > { %v1196_v32 = vpop.f32.mrf.mxu1  ;;  %v388_v34 = vpop.f32.mrf.mxu0 }
  0xf5   : > { %v408_v35 = vpop.f32.mrf.mxu1  ;;  %v1212_v36 = vpop.f32.mrf.mxu0 }
  0xf7   : > { %v1201_v37 = vpop.f32.mrf.mxu1  ;;  %v625_v38 = vpop.f32.mrf.mxu0 }
  0xf8   : > { %v504_v39 = vadd.f32 %v1201_v37, %v1190_v31 }
  0xf9   : > { %v498_v43 = vpop.f32.mrf.mxu1  ;;  %v1215_v45 = vpop.f32.mrf.mxu0 }
  0xfa   : > { %v655_v46 = vadd.f32 %v1212_v36, %v504_v39  ;;  %v499_v47 = vadd.f32 %v498_v43, %v388_v34 }
  0xfb   : > { %v1204_v48 = vpop.f32.mrf.mxu1  ;;  %v635_v52 = vpop.f32.mrf.mxu0 }
  0xfc   : > { %v668_v49 = vadd.f32 %v1107_v40, %v655_v46  ;;  %v654_v50 = vadd.f32 %v625_v38, %v499_v47  ;;  %v514_v51 = vadd.f32 %v1204_v48, %v1193_v29 }
  0xfd   : > { %v508_v53 = vpop.f32.mrf.mxu1  ;;  %v1218_v63 = vpop.f32.mrf.mxu0 }
  0xfe   : > { %v667_v54 = vadd.f32 %v1107_v40, %v654_v50  ;;  %v657_v55 = vadd.f32 %v1215_v45, %v514_v51  ;;  %v674_v56 = vmax.f32 %v668_v49, 0.0  ;;  %v509_v57 = vadd.f32 %v508_v53, %v398_v30  ;;  %v1108_v45 = vld [vmem:[%s1666_s5] ss:$0 sm:$0xff] }
  0xff   : > { %v1207_v59 = vpop.f32.mrf.mxu1  ;;  %v645_v10 = vpop.f32.mrf.mxu0 }
 0x100   : > { %v673_v60 = vmax.f32 %v667_v54, 0.0  ;;  %v698_v61 = vmul.f32 %v690_v58, %v674_v56  ;;  %v656_v62 = vadd.f32 %v635_v52, %v509_v57  ;;  %v670_v0 = vadd.f32 %v1107_v40, %v657_v55 }
 0x101   : > { %v524_v1 = vadd.f32 %v1207_v59, %v1196_v32  ;;  %v518_v2 = vpop.f32.mrf.mxu1 }
 0x102   : > { %v697_v3 = vmul.f32 %v685_v42, %v673_v60  ;;  %v669_v4 = vadd.f32 %v1107_v40, %v656_v62  ;;  %v519_v6 = vadd.f32 %v518_v2, %v408_v35  ;;  %v710_v8 = vrot.slane %v698_v61, 1 }
 0x103   : > { %v659_v5 = vadd.f32 %v1218_v63, %v524_v1  ;;  %v724_v9 = vrot.slane %v698_v61, 2  ;;  %v676_v13 = vmax.f32 %v670_v0, 0.0 }
 0x104   : > { %v723_v7 = vrot.slane %v697_v3, 2  ;;  %v709_v12 = vrot.slane %v697_v3, 1  ;;  %v658_v15 = vadd.f32 %v645_v10, %v519_v6  ;;  %v675_v16 = vmax.f32 %v669_v4, 0.0 }
 0x105   : > { %v672_v14 = vadd.f32 %v1107_v40, %v659_v5  ;;  %v700_v22 = vmul.f32 %v685_v42, %v676_v13 }
 0x106   : > { %v711_v17 = vsel %vm288_vm1, %v709_v12, %v710_v8  ;;  %v725_v18 = vsel %vm527_vm3, %v723_v7, %v724_v9  ;;  %v671_v19 = vadd.f32 %v1107_v40, %v658_v15  ;;  %v699_v21 = vmul.f32 %v695_v11, %v675_v16 }
 0x107   : > { %v678_v20 = vmax.f32 %v672_v14, 0.0  ;;  %860 = vmatprep.mubr.f32.mxu1 %v711_v17  ;;  %946 = vmatmul.mubr.f32.vlgmr.msra.gmra.mxu0 %v725_v18  ;;  %v714_v30 = vrot.slane %v700_v22, 1  ;;  %v728_v32 = vrot.slane %v700_v22, 2 }
 0x108   : > { %861 = vmatmul.mubr.f32.vlgmr.msra.gmra.mxu1 %v697_v3  ;;  %1111 = vmatprep.mubr.msk.f32.mxu0 %vm305_vm2, %v1537_v33  ;;  %v677_v23 = vmax.f32 %v671_v19, 0.0  ;;  %v712_v24 = vrot.slane %v699_v21, 1  ;;  %v726_v25 = vrot.slane %v699_v21, 2 }
 0x109   : > { %v702_v27 = vmul.f32 %v695_v11, %v678_v20 }
 0x10a   : > { %v701_v26 = vmul.f32 %v690_v58, %v677_v23  ;;  %v713_v28 = vsel %vm288_vm1, %v710_v8, %v712_v24  ;;  %v727_v29 = vsel %vm527_vm3, %v724_v9, %v726_v25 }
 0x10b   : > { %865 = vmatprep.mubr.f32.mxu1 %v713_v28  ;;  %951 = vmatmul.mubr.f32.gmra.mxu0 %v727_v29  ;;  %v717_v33 = vrot.slane %v702_v27, 1  ;;  %v731_v38 = vrot.slane %v702_v27, 2 }
 0x10c   : > { %866 = vmatmul.mubr.f32.gmra.mxu1 %v698_v61  ;;  %v715_v31 = vrot.slane %v701_v26, 1  ;;  %v729_v34 = vrot.slane %v701_v26, 2  ;;  %1112 = vmatprep.mubr.msk.f32.mxu0 %vm305_vm2, %v1553_v41 }
 0x10e   : > { %v716_v35 = vsel %vm288_vm1, %v714_v30, %v715_v31  ;;  %v730_v36 = vsel %vm527_vm3, %v728_v32, %v729_v34  ;;  %v718_v37 = vsel %vm288_vm1, %v715_v31, %v717_v33  ;;  %v732_v39 = vsel %vm527_vm3, %v729_v34, %v731_v38 }
 0x10f   : > { %870 = vmatprep.mubr.f32.mxu1 %v716_v35  ;;  %956 = vmatmul.mubr.f32.gmra.mxu0 %v730_v36 }
 0x110   : > { %871 = vmatmul.mubr.f32.gmra.mxu1 %v700_v22  ;;  %1113 = vmatprep.mubr.msk.f32.mxu0 %vm305_vm2, %v1557_v44 }
 0x111   : > { %875 = vmatprep.mubr.f32.mxu1 %v718_v37 }
 0x113   : > { %961 = vmatmul.mubr.f32.gmra.mxu0 %v732_v39 }
 0x114   : > { %876 = vmatmul.mubr.f32.gmra.mxu1 %v701_v26 }
 0x1c7   : > { %v947_v41 = vpop.f32.mrf.mxu0 }
 0x1c8   : > { %v1174_v42 = vpop.f32.mrf.mxu1 }
 0x1c9   : > { %v949_v40 = vpop.f32.mrf.mxu0 }
 0x1ca   : > { %v1175_v43 = vpop.f32.mrf.mxu1 }
 0x1cb   : > { %v1176_v46 = vadd.f32 %v1175_v43, %v1174_v42  ;;  %v952_v47 = vpop.f32.mrf.mxu0 }
 0x1cc   : > { %v1177_v48 = vpop.f32.mrf.mxu1 }
 0x1cd   : > { %v863_v49 = vadd.f32 %v1176_v46, %v1108_v45  ;;  %v954_v50 = vpop.f32.mrf.mxu0 }
 0x1ce   : > { %v1178_v51 = vpop.f32.mrf.mxu1 }
 0x1cf   : > { %v1179_v52 = vadd.f32 %v1178_v51, %v1177_v48  ;;  %v957_v44 = vpop.f32.mrf.mxu0  ;;  %v948_v54 = vadd.f32 %v947_v41, %v863_v49 }
 0x1d0   : > { %v1180_v53 = vpop.f32.mrf.mxu1 }
 0x1d1   : > { %v868_v55 = vadd.f32 %v1179_v52, %v1108_v45  ;;  %v959_v56 = vpop.f32.mrf.mxu0  ;;  %v966_v62 = vmax.f32 %v948_v54, 0.0 }
 0x1d2   : > { %v1181_v57 = vpop.f32.mrf.mxu1 }
 0x1d3   : > { %v953_v58 = vadd.f32 %v952_v47, %v868_v55  ;;  %v1182_v59 = vadd.f32 %v1181_v57, %v1180_v53  ;;  %v962_v60 = vpop.f32.mrf.mxu0 }
 0x1d4   : > { %v1183_v61 = vpop.f32.mrf.mxu1 }
 0x1d5   : > { %v967_v63 = vmax.f32 %v953_v58, 0.0  ;;  %v873_v0 = vadd.f32 %v1182_v59, %v1108_v45  ;;  %v964_v1 = vpop.f32.mrf.mxu0 }
 0x1d6   : > { %v1184_v2 = vpop.f32.mrf.mxu1 }
 0x1d7   : > { %v970_v3 = vmax.f32 %v966_v62, %v967_v63  ;;  %v1185_v4 = vadd.f32 %v1184_v2, %v1183_v61  ;;  %v958_v6 = vadd.f32 %v957_v44, %v873_v0 }
 0x1d9   : > { %v971_v5 = vrot.slane %v970_v3, 4  ;;  %v878_v7 = vadd.f32 %v1185_v4, %v1108_v45  ;;  %v968_v11 = vmax.f32 %v958_v6, 0.0 }
 0x1db   : > { %v972_v8 = vmax.f32 %v970_v3, %v971_v5  ;;  %v963_v9 = vadd.f32 %v962_v60, %v878_v7 }
 0x1dd   : > { %v973_v10 = vrot.slane %v972_v8, 2  ;;  %v969_v12 = vmax.f32 %v963_v9, 0.0 }
 0x1df   : > { %v974_v13 = vmax.f32 %v972_v8, %v973_v10  ;;  %v977_v14 = vmax.f32 %v968_v11, %v969_v12 }
 0x1e1   : > { %v975_v15 = vrot.slane %v974_v13, 1  ;;  %v978_v16 = vrot.slane %v977_v14, 4 }
 0x1e3   : > { %v976_v17 = vmax.f32 %v974_v13, %v975_v15  ;;  %v979_v18 = vmax.f32 %v977_v14, %v978_v16 }
 0x1e5   : > { %v980_v19 = vrot.slane %v979_v18, 2  ;;  %984 = vst [vmem:[%s262_s10] sm:$0x1] %v976_v17 }
 0x1e7   : > { %v981_v20 = vmax.f32 %v979_v18, %v980_v19 }
 0x1e9   : > { %v982_v21 = vrot.slane %v981_v20, 1 }
 0x1eb   : > { %v983_v22 = vmax.f32 %v981_v20, %v982_v21 }
 0x1ed   : > { %985 = vst [vmem:[%s262_s10 + $0x1] sm:$0x1] %v983_v22 }
 0x1ee   : > { %1318 = shalt.err (!%p1315_p0)
}
 0x1ef   : > { %s1319_s20 = scalar_lea.hbm %s1617_s15, 32  ;;  %s1323_s29 = scalar_lea.hbm %s1667_s6, 96 }
 0x1f0   : > { %p1320_p1 = scmp.ne.s32.totalorder %s1617_s15, %s1319_s20  ;;  %p1324_p4 = scmp.lt.s32.totalorder %s1617_s15, %s1667_s6 }
 0x1f1   : > { %p1325_p7 = scmp.lt.s32.totalorder %s1323_s29, %s1319_s20 }
 0x1f2   : > { %p1321_p2 = pnand %p1320_p1, %p1452_p5 }
 0x1f3   : > { %p1326_p8 = por %p1325_p7, %p1324_p4 }
 0x1f4   : > { %p1322_p3 = pneg %p1321_p2 }
 0x1f6   : > { %p1327_p6 = pnand %p1326_p8, %p1322_p3 }
 0x1f8   : > { %1330 = shalt.err (!%p1327_p6)
}
 0x1f9   : > { %s1377_s11 = smov 16   ;;  %s1378_s13 = smov 1  }
 0x1fa   : > { %1225 = dma.vmem_to_hbm [thread:$0]  (%p1452_p5), %s1619_s12, 32, %s1617_s15, %s1621_s16, %s1377_s11, %s1377_s11, %s1378_s13  }
 0x1fb PF: > { %p1237_p9 = scmp.ge.s32.totalorder %s1369_s24, 2  ;;  %s1015_s14 = sand.u32 1, %s1357_s21  }
 0x1fc   : > { %p1671_p10 = scmp.ne.s32.totalorder %s1669_s8, 0  ;;  %s1016_s17 = scalar_lea.sflag [#allocation4], %s1015_s14 }
 0x1fe   : > { %p1232_p11 = pnand %p1237_p9, %p1671_p10 }
 0x200   : > { %p1233_p12 = pneg %p1232_p11 }
 0x202   : > { %1352 = dma.done.wait (%p1233_p12), %s1016_s17, 32  }
 0x203   : > { %1354 = vsyncadd (%p1233_p12), %s1016_s17, 4294967264  ;;  %p17_p13 = scmp.ge.s32.totalorder %s1439_s27, 5   ;;  %s1672_s21 = smov %s1361_s22 }
 0x204   : > { %s1673_s22 = smov %s1365_s23  ;;  %s1674_s23 = smov %s1450_s30 }
 0x205   : > { %s1675_s24 = smov %s1439_s27  ;;  %19 = sbr.rel (!%p17_p13) target bundleno = 4 (0x4), region = 86 }
 0x20a   :  { %1021 = vsyncpa [#allocation3], 1 }
 0x20b   :  { %1023 = vsyncpa [#allocation3 + $0x1], 1 }
 0x20c   :  { %1024 = vsyncpa [#allocation4], 1 }
 0x20d   :  { %1026 = vsyncpa [#allocation4 + $0x1], 1 }

</bundles_post_ra>
